<compile_context>
chip_gen: v7x
topology: tpu7x:2x2x1
jax: 0.10.0
libtpu: 0.0.40
codegen_flags: <defaults>
</compile_context>

<pallas_src>
import functools
import math

import jax
import jax.numpy as jnp
from jax.experimental import pallas as pl
from jax.experimental.pallas import tpu as pltpu


def _round_up(x, m):
    return (x + m - 1) // m * m


def _vmem_capacity_bytes():
    try:
        return int(pltpu.get_tpu_info().vmem_capacity_bytes)
    except Exception:
        return 64 * 1024 * 1024   # conservative fallback: v7x per-TensorCore VMEM


def _vmem_estimate(tm, tk, d_model, io_bpe, w_bpe, out_bpe, n_k):
    """Rough per-kernel VMEM footprint: double-buffered tiles + scratch + temporaries."""
    est = (2 * tm * d_model * io_bpe           # x tiles (double buffered, MXU dtype)
           + 2 * d_model * tk * w_bpe          # W1 slices
           + 2 * tk * d_model * w_bpe          # W2 slices
           + 2 * tk * 4 + 2 * d_model * 4      # bias tiles (f32)
           + 2 * tm * d_model * out_bpe        # out tiles
           + tm * tk * (4 + w_bpe))            # h temporary (f32) + its low-precision cast
    if n_k > 1:
        est += tm * d_model * 4                # f32 accumulator scratch
    return est


# ----------------------------------------------------------------------------- kernels
def _ffn_kernel_single(x_ref, w1_ref, b1_ref, w2_ref, b2_ref, o_ref):
    # Whole d_ff fits one slice: single fused pass, no accumulator scratch.
    h = jnp.dot(x_ref[...], w1_ref[...], preferred_element_type=jnp.float32)
    h = jnp.maximum(h + b1_ref[...], 0.0)                 # bias + ReLU in f32 (VPU)
    # dropout == identity (eval mode)
    o_ref[...] = (jnp.dot(h.astype(w2_ref.dtype), w2_ref[...],
                          preferred_element_type=jnp.float32)
                  + b2_ref[...]).astype(o_ref.dtype)


def _ffn_kernel_multi(x_ref, w1_ref, b1_ref, w2_ref, b2_ref, o_ref, acc_ref):
    # Grid: (i over row tiles [parallel], k over d_ff slices [arbitrary/reduction]).
    # x_ref:  (tm, d_model)      MXU-dtype row tile (pre-cast in the wrapper)
    # w1_ref: (d_model, tk)      W1 slice          w2_ref: (tk, d_model) W2 slice
    # b1_ref: (1, tk) f32        b2_ref: (1, d_model) f32
    # acc_ref:(tm, d_model) f32  accumulator across k
    k = pl.program_id(1)

    @pl.when(k == 0)
    def _():
        acc_ref[...] = jnp.zeros_like(acc_ref)

    h = jnp.dot(x_ref[...], w1_ref[...], preferred_element_type=jnp.float32)
    h = jnp.maximum(h + b1_ref[...], 0.0)                 # bias + ReLU in f32 (VPU)
    # dropout == identity (eval mode)
    acc_ref[...] += jnp.dot(h.astype(w2_ref.dtype), w2_ref[...],
                            preferred_element_type=jnp.float32)

    @pl.when(k == pl.num_programs(1) - 1)
    def _():
        o_ref[...] = (acc_ref[...] + b2_ref[...]).astype(o_ref.dtype)


# ---------------------------------------------------------------------- weight prep (cold path)
def _choose_dff_tiling(d_ff, tk_req):
    tk = min(int(tk_req), d_ff)
    if tk < d_ff:
        tk = _round_up(tk, 256)          # 256x256 MXU tile on v6e/v7x (128 is fine on v5e)
    if tk >= d_ff:
        return d_ff, d_ff, 1             # single slice, no padding needed
    d_ff_pad = _round_up(d_ff, tk)
    return tk, d_ff_pad, d_ff_pad // tk


def prepare_ffn_params(w1, b1, w2, b2, *, tk_ff=512, mxu_dtype=jnp.bfloat16):
    """One-time prep: cast weights to the MXU dtype and zero-pad d_ff to the slice size.

    Call once and reuse (see make_ffn) so the per-forward hot path never pays the full
    weight cast/pad HBM traffic again.
    """
    d_model, d_ff = w1.shape
    tk_eff, d_ff_pad, _ = _choose_dff_tiling(d_ff, tk_ff)
    w1_m = jnp.asarray(w1, mxu_dtype)
    w2_m = jnp.asarray(w2, mxu_dtype)
    b1_f = jnp.asarray(b1, jnp.float32).reshape(1, d_ff)
    b2_f = jnp.asarray(b2, jnp.float32).reshape(1, d_model)
    if d_ff_pad != d_ff:
        # Zero-padded d_ff slots: relu(x@0 + 0) @ 0 contributes exactly nothing.
        w1_m = jnp.pad(w1_m, ((0, 0), (0, d_ff_pad - d_ff)))
        w2_m = jnp.pad(w2_m, ((0, d_ff_pad - d_ff), (0, 0)))
        b1_f = jnp.pad(b1_f, ((0, 0), (0, d_ff_pad - d_ff)))
    return (w1_m, b1_f, w2_m, b2_f), tk_eff


# ----------------------------------------------------------------------------- hot path
@functools.partial(jax.jit, static_argnames=("tm", "tk_eff", "out_dtype"))
def _ffn_forward(x, w1_m, b1_f, w2_m, b2_f, *, tm, tk_eff, out_dtype):
    orig_shape = x.shape
    d_model = orig_shape[-1]
    M = math.prod(orig_shape[:-1])
    d_ff_pad = w1_m.shape[1]
    n_k = d_ff_pad // tk_eff
    mxu_dtype = w1_m.dtype

    # Pre-cast x: halves its DMA bytes / double-buffered VMEM and avoids re-running a
    # tm*d_model VPU convert on every k step (the x block is resident across k).
    x2d = x.reshape(M, d_model).astype(mxu_dtype)

    io_bpe = jnp.dtype(mxu_dtype).itemsize
    out_bpe = jnp.dtype(out_dtype).itemsize
    vmem_cap = _vmem_capacity_bytes()
    budget = int(0.75 * vmem_cap)

    # ---- row-tile selection (aligned to (8,128) layout rules) ----------------
    tm_eff = min(_round_up(tm, 8), _round_up(M, 8))
    if M >= 512:
        # Keep >= 2 row tiles so the "parallel" axis can feed v7x's two TensorCores.
        tm_eff = min(tm_eff, _round_up(-(-M // 2), 8))
    while tm_eff > 128 and _vmem_estimate(tm_eff, tk_eff, d_model, io_bpe, io_bpe,
                                          out_bpe, n_k) > budget:
        tm_eff -= 128
    tm_eff = max(tm_eff, 8)
    # TODO(synk): for very large d_model (>= 8192) also tile the output/W2 columns on an
    #             extra grid axis so the f32 accumulator is tm x tn; not needed here.

    M_pad = _round_up(M, tm_eff)
    if M_pad != M:
        x2d = jnp.pad(x2d, ((0, M_pad - M), (0, 0)))     # padded rows sliced off below
    n_m = M_pad // tm_eff

    est = _vmem_estimate(tm_eff, tk_eff, d_model, io_bpe, io_bpe, out_bpe, n_k)
    vmem_limit = int(min(max(int(est * 1.4), 32 * 1024 * 1024), int(0.9 * vmem_cap)))

    # Weights are re-streamed once per row tile -> count them n_m times.
    cost = pl.CostEstimate(
        flops=4 * M_pad * d_model * d_ff_pad,
        transcendentals=0,
        bytes_accessed=(M_pad * d_model * (io_bpe + out_bpe)
                        + n_m * (2 * d_model * d_ff_pad * io_bpe
                                 + d_ff_pad * 4 + d_model * 4)))

    if n_k == 1:
        grid = (n_m,)
        kernel = _ffn_kernel_single
        in_specs = [
            pl.BlockSpec((tm_eff, d_model), lambda i: (i, 0)),      # x tile
            pl.BlockSpec((d_model, d_ff_pad), lambda i: (0, 0)),    # W1 (full)
            pl.BlockSpec((1, d_ff_pad), lambda i: (0, 0)),          # b1
            pl.BlockSpec((d_ff_pad, d_model), lambda i: (0, 0)),    # W2 (full)
            pl.BlockSpec((1, d_model), lambda i: (0, 0)),           # b2
        ]
        out_specs = pl.BlockSpec((tm_eff, d_model), lambda i: (i, 0))
        scratch = []
        dims = ("parallel",)
    else:
        grid = (n_m, n_k)                                           # rows parallel, d_ff last
        kernel = _ffn_kernel_multi
        in_specs = [
            pl.BlockSpec((tm_eff, d_model), lambda i, k: (i, 0)),   # x tile
            pl.BlockSpec((d_model, tk_eff), lambda i, k: (0, k)),   # W1 slice
            pl.BlockSpec((1, tk_eff), lambda i, k: (0, k)),         # b1 slice
            pl.BlockSpec((tk_eff, d_model), lambda i, k: (k, 0)),   # W2 slice
            pl.BlockSpec((1, d_model), lambda i, k: (0, 0)),        # b2
        ]
        out_specs = pl.BlockSpec((tm_eff, d_model), lambda i, k: (i, 0))
        scratch = [pltpu.VMEM((tm_eff, d_model), jnp.float32)]
        dims = ("parallel", "arbitrary")

    out2d = pl.pallas_call(
        kernel,
        out_shape=jax.ShapeDtypeStruct((M_pad, d_model), out_dtype),
        grid_spec=pltpu.PrefetchScalarGridSpec(
            num_scalar_prefetch=0,
            grid=grid,
            in_specs=in_specs,
            out_specs=out_specs,
            scratch_shapes=scratch),
        compiler_params=pltpu.CompilerParams(
            dimension_semantics=dims,
            vmem_limit_bytes=vmem_limit),
        cost_estimate=cost,
    )(x2d, w1_m, b1_f, w2_m, b2_f)

    return out2d[:M].reshape(orig_shape)


# ----------------------------------------------------------------------------- public API
def make_ffn(w1, b1, w2, b2, *, tm=768, tk_ff=512, mxu_dtype=jnp.bfloat16,
             out_dtype=None):
    """Build a reusable forward fn with weights pre-cast / pre-padded (cached)."""
    params, tk_eff = prepare_ffn_params(w1, b1, w2, b2, tk_ff=tk_ff, mxu_dtype=mxu_dtype)

    def apply(x):
        od = jnp.dtype(out_dtype if out_dtype is not None else x.dtype)
        return _ffn_forward(x, *params, tm=int(tm), tk_eff=int(tk_eff), out_dtype=od)

    return apply


def feed_forward_block(x, w1, b1, w2, b2, *, tm=768, tk_ff=512,
                       mxu_dtype=jnp.bfloat16):
    """One-shot convenience wrapper (for repeated calls prefer make_ffn).
    x: (batch, seq, d_model) -> (batch, seq, d_model)."""
    params, tk_eff = prepare_ffn_params(w1, b1, w2, b2, tk_ff=tk_ff, mxu_dtype=mxu_dtype)
    return _ffn_forward(x, *params, tm=int(tm), tk_eff=int(tk_eff),
                        out_dtype=jnp.dtype(x.dtype))


# ----------------------------------------------------------------------------- test utils
def init_params(key, d_model, d_ff, dtype=jnp.float32):
    """Deterministic init matching nn.Linear shapes (weights stored transposed)."""
    k1, k2, k3, k4 = jax.random.split(key, 4)
    bound1 = 1.0 / (d_model ** 0.5)   # fan_in = d_model for linear_1
    bound2 = 1.0 / (d_ff ** 0.5)      # fan_in = d_ff    for linear_2
    w1 = jax.random.uniform(k1, (d_model, d_ff), dtype, -bound1, bound1)
    b1 = jax.random.uniform(k2, (d_ff,), dtype, -bound1, bound1)
    w2 = jax.random.uniform(k3, (d_ff, d_model), dtype, -bound2, bound2)
    b2 = jax.random.uniform(k4, (d_model,), dtype, -bound2, bound2)
    return w1, b1, w2, b2


def _reference(x, w1, b1, w2, b2, mxu_dtype=jnp.bfloat16):
    """Pure-JAX reference mirroring the kernel's MXU-operand quantization."""
    f32 = jnp.float32
    hp = jax.lax.Precision.HIGHEST
    xq = x.astype(mxu_dtype).astype(f32)
    w1q = w1.astype(mxu_dtype).astype(f32)
    w2q = w2.astype(mxu_dtype).astype(f32)
    h = jnp.maximum(jnp.einsum("bsd,df->bsf", xq, w1q, precision=hp) + b1, 0.0)
    hq = h.astype(mxu_dtype).astype(f32)
    return jnp.einsum("bsf,fd->bsd", hq, w2q, precision=hp) + b2


if __name__ == "__main__":
    key = jax.random.PRNGKey(0)

    # Case 1: module-spec shapes; single d_ff slice -> fused single-pass kernel,
    # weights pre-converted once via make_ffn.
    batch, seq, d_model, d_ff = 2, 8, 32, 64
    kx, kp, key = jax.random.split(key, 3)
    x = jax.random.normal(kx, (batch, seq, d_model), jnp.float32)
    w1, b1, w2, b2 = init_params(kp, d_model, d_ff)
    ffn = make_ffn(w1, b1, w2, b2)
    out = jax.block_until_ready(ffn(x))
    ref = _reference(x, w1, b1, w2, b2)
    assert out.shape == (batch, seq, d_model)
    assert jnp.allclose(out, ref, atol=2e-3, rtol=2e-3), \
        float(jnp.max(jnp.abs(out - ref)))

    # Case 2: exercises row padding, d_ff slicing + padding (n_k=2) and the f32 accumulator.
    batch, seq, d_model, d_ff = 2, 24, 128, 384
    kx, kp, key = jax.random.split(key, 3)
    x = jax.random.normal(kx, (batch, seq, d_model), jnp.float32)
    w1, b1, w2, b2 = init_params(kp, d_model, d_ff)
    out = jax.block_until_ready(
        feed_forward_block(x, w1, b1, w2, b2, tm=32, tk_ff=256))
    ref = _reference(x, w1, b1, w2, b2)
    assert out.shape == (batch, seq, d_model)
    assert jnp.allclose(out, ref, atol=2e-3, rtol=2e-3), \
        float(jnp.max(jnp.abs(out - ref)))

    print("KERNEL_OK")
</pallas_src>

<mosaic_0001>
module attributes {stable_mosaic.version = 11 : i64} {
  func.func @_ffn_kernel_single(%arg0: i32, %arg1: memref<16x32xbf16, #tpu.memory_space<vmem>>, %arg2: memref<32x64xbf16, #tpu.memory_space<vmem>>, %arg3: memref<1x64xf32, #tpu.memory_space<vmem>>, %arg4: memref<64x32xbf16, #tpu.memory_space<vmem>>, %arg5: memref<1x32xf32, #tpu.memory_space<vmem>>, %arg6: memref<16x32xf32, #tpu.memory_space<vmem>>) attributes {dimension_semantics = [#tpu.dimension_semantics<parallel>], iteration_bounds = array<i64: 1>, scalar_prefetch = 0 : i64, scratch_operands = 0 : i64, tpu.core_type = #tpu.core_type<tc>, window_params = [{transform_indices = @transform_0, window_bounds = array<i64: 16, 32>}, {pipeline_mode = #tpu.pipeline_mode<synchronous>, transform_indices = @transform_1, window_bounds = array<i64: 32, 64>}, {pipeline_mode = #tpu.pipeline_mode<synchronous>, transform_indices = @transform_2, window_bounds = array<i64: 1, 64>}, {pipeline_mode = #tpu.pipeline_mode<synchronous>, transform_indices = @transform_3, window_bounds = array<i64: 64, 32>}, {pipeline_mode = #tpu.pipeline_mode<synchronous>, transform_indices = @transform_4, window_bounds = array<i64: 1, 32>}, {transform_indices = @transform_5, window_bounds = array<i64: 16, 32>}]} {
    %c0 = arith.constant 0 : index
    %c0_0 = arith.constant 0 : index
    %0 = vector.load %arg1[%c0, %c0_0] : memref<16x32xbf16, #tpu.memory_space<vmem>>, vector<16x32xbf16>
    %c0_1 = arith.constant 0 : index
    %c0_2 = arith.constant 0 : index
    %1 = vector.load %arg2[%c0_1, %c0_2] : memref<32x64xbf16, #tpu.memory_space<vmem>>, vector<32x64xbf16>
    %cst = arith.constant dense<0.000000e+00> : vector<16x64xf32>
    %2 = tpu.matmul %0, %1, %cst {dimension_numbers = #tpu.dot_dimension_numbers<[1], [0], [0], [1], [0, 0, 1, 1], [], []>} : vector<16x32xbf16>, vector<32x64xbf16>, vector<16x64xf32> -> vector<16x64xf32>
    %c0_3 = arith.constant 0 : index
    %c0_4 = arith.constant 0 : index
    %3 = vector.load %arg3[%c0_3, %c0_4] : memref<1x64xf32, #tpu.memory_space<vmem>>, vector<1x64xf32>
    %4 = vector.broadcast %3 : vector<1x64xf32> to vector<16x64xf32>
    %5 = arith.addf %2, %4 : vector<16x64xf32>
    %cst_5 = arith.constant 0.000000e+00 : f32
    %6 = vector.broadcast %cst_5 : f32 to vector<16x64xf32>
    %7 = arith.maximumf %5, %6 : vector<16x64xf32>
    %8 = arith.truncf %7 : vector<16x64xf32> to vector<16x64xbf16>
    %c0_6 = arith.constant 0 : index
    %c0_7 = arith.constant 0 : index
    %9 = vector.load %arg4[%c0_6, %c0_7] : memref<64x32xbf16, #tpu.memory_space<vmem>>, vector<64x32xbf16>
    %cst_8 = arith.constant dense<0.000000e+00> : vector<16x32xf32>
    %10 = tpu.matmul %8, %9, %cst_8 {dimension_numbers = #tpu.dot_dimension_numbers<[1], [0], [0], [1], [0, 0, 1, 1], [], []>} : vector<16x64xbf16>, vector<64x32xbf16>, vector<16x32xf32> -> vector<16x32xf32>
    %c0_9 = arith.constant 0 : index
    %c0_10 = arith.constant 0 : index
    %11 = vector.load %arg5[%c0_9, %c0_10] : memref<1x32xf32, #tpu.memory_space<vmem>>, vector<1x32xf32>
    %12 = vector.broadcast %11 : vector<1x32xf32> to vector<16x32xf32>
    %13 = arith.addf %10, %12 : vector<16x32xf32>
    %c0_11 = arith.constant 0 : index
    %c0_12 = arith.constant 0 : index
    %14 = vector.load %arg6[%c0_11, %c0_12] : memref<16x32xf32, #tpu.memory_space<vmem>>, vector<16x32xf32>
    tpu.vector_store %arg6[%c0_11, %c0_12], %13 {strides = array<i32>} : memref<16x32xf32, #tpu.memory_space<vmem>>, vector<16x32xf32>,
    return
  }
  func.func @transform_0(%arg0: i32) -> (i32, i32) {
    %c0_i32 = arith.constant 0 : i32
    %c0_i32_0 = arith.constant 0 : i32
    return %arg0, %c0_i32 : i32, i32
  }
  func.func @transform_1(%arg0: i32) -> (i32, i32) {
    %c0_i32 = arith.constant 0 : i32
    %c0_i32_0 = arith.constant 0 : i32
    %c0_i32_1 = arith.constant 0 : i32
    return %c0_i32, %c0_i32_0 : i32, i32
  }
  func.func @transform_2(%arg0: i32) -> (i32, i32) {
    %c0_i32 = arith.constant 0 : i32
    %c0_i32_0 = arith.constant 0 : i32
    %c0_i32_1 = arith.constant 0 : i32
    return %c0_i32, %c0_i32_0 : i32, i32
  }
  func.func @transform_3(%arg0: i32) -> (i32, i32) {
    %c0_i32 = arith.constant 0 : i32
    %c0_i32_0 = arith.constant 0 : i32
    %c0_i32_1 = arith.constant 0 : i32
    return %c0_i32, %c0_i32_0 : i32, i32
  }
  func.func @transform_4(%arg0: i32) -> (i32, i32) {
    %c0_i32 = arith.constant 0 : i32
    %c0_i32_0 = arith.constant 0 : i32
    %c0_i32_1 = arith.constant 0 : i32
    return %c0_i32, %c0_i32_0 : i32, i32
  }
  func.func @transform_5(%arg0: i32) -> (i32, i32) {
    %c0_i32 = arith.constant 0 : i32
    %c0_i32_0 = arith.constant 0 : i32
    return %arg0, %c0_i32 : i32, i32
  }
}

</mosaic_0001>

<bundles_post_ra>
// kernel: _ffn_forward.1
= control target key start
LH: loop header
LB: loop body
LE: loop exit
PB: predicated region body
PF: predicated region fallthrough
CT: control target
= control target key end

     0   :  { %v277_v1 = vmov 0.0   ;;  %vm278_vm0 = vmmov 0   ;;  %vm52_vm1 = vcmask 261120   ;;  %s354_s0 = inlined_call_operand.vmem [shape: bf16[16,32], index: 0, kind: input, shape index: {}]   ;;  %s355_s1 = inlined_call_operand.vmem [shape: bf16[32,64], index: 1, kind: input, shape index: {}]   ;;  %s356_s2 = inlined_call_operand.vmem [shape: f32[1,64], index: 2, kind: input, shape index: {}]   ;;  %s357_s3 = inlined_call_operand.vmem [shape: bf16[64,32], index: 3, kind: input, shape index: {}]   ;;  %s358_s4 = inlined_call_operand.vmem [shape: f32[1,32], index: 4, kind: input, shape index: {}]   ;;  %s359_s5 = inlined_call_operand.hbm [shape: f32[16,32], index: 5, kind: output, shape index: {}]  }
   0x1   :  { %v246_v0 = vld [vmem:[%s355_s1] sm:$0xff]   ;;  %221 = vmatprep.subr.bf16.mxu0 %v277_v1  ;;  %229 = vmatprep.subr.bf16.mxu1 %v277_v1  ;;  %v247_v2 = vld [vmem:[%s355_s1 + $0x8] sm:$0xff]  }
   0x2   :  { %222 = vmatpush3.bf16.msra.mxu0 %v246_v0  ;;  %225 = vmatprep.mubr.msk.bf16.mxu0 %vm278_vm0, %v277_v1  ;;  %v249_v3 = vld [vmem:[%s357_s3] sm:$0xff]   ;;  %v250_v5 = vld [vmem:[%s357_s3 + $0x8] sm:$0xff]  }
   0x3   :  { %223 = vmatprep.subr.bf16.mxu0 %v277_v1  ;;  %237 = vmatprep.mubr.msk.bf16.mxu1 %vm278_vm0, %v277_v1  ;;  %v248_v4 = vld [vmem:[%s354_s0] sm:$0xff]  }
   0x4   :  { %230 = vmatpush3.bf16.msra.mxu1 %v249_v3 }
   0x5   :  { %231 = vmatprep.subr.bf16.mxu1 %v277_v1 }
   0x6   :  { %224 = vmatpush3.bf16.msra.mxu0 %v247_v2 }
   0x7   :  { %10 = vsyncpa [#allocation3], 0  ;;  %v251_v6 = vld [vmem:[%s357_s3 + $0x10] sm:$0xff]   ;;  %v252_v7 = vld [vmem:[%s357_s3 + $0x18] sm:$0xff]   ;;  %vm139_vm2 = vcmask 523264   ;;  %s279_s3 = smov [#allocation2]  }
   0x8   :  { %232 = vmatpush3.bf16.msra.mxu1 %v250_v5  ;;  %v202_v8 = vld [vmem:[%s356_s2] ss:$0 sm:$0xff]  ;;  %s191_s9 = sshll.u32 %s279_s3, 4  ;;  %s192_s9 = int_to_ptr.vmem [resolvable:$true] %s191_s9 }
   0x9   :  { %226 = vmatmul.mubr.msk.bf16.vlgmr.msra.gmra.mrb[0].mxu0 %vm52_vm1, %v248_v4  ;;  %233 = vmatprep.subr.bf16.mxu1 %v277_v1  ;;  %v207_v18 = vld [vmem:[%s358_s4] ss:$0 sm:$0xff]  ;;  %s253_s2 = scalar_lea.vmem %s192_s9, 256  ;;  %p258_p1 = scmp.lt.s32.totalorder %s192_s9, %s192_s9 }
   0xa   :  { %p254_p0 = scmp.ne.s32.totalorder %s192_s9, %s253_s2  ;;  %p259_p2 = scmp.lt.s32.totalorder %s253_s2, %s253_s2 }
   0xc   :  { %234 = vmatpush3.bf16.msra.mxu1 %v251_v6  ;;  %p260_p3 = por %p259_p2, %p258_p1 }
   0xd   :  { %235 = vmatprep.subr.bf16.mxu1 %v277_v1 }
   0xe   :  { %p261_p4 = pnand %p260_p3, %p254_p0 }
  0x10   :  { %236 = vmatpush3.bf16.msra.mxu1 %v252_v7 }
  0xdc   :  { %v90_v9 = vpop.f32.mrb[0].mxu0 }
  0xdd   :  { %v91_v10 = vadd.f32 %v202_v8, %v90_v9  ;;  %v227_v11 = vpop.f32.mrb[1].mxu0 }
  0xde   :  { %v93_v12 = vpop.f32.mrb[2].mxu0 }
  0xdf   :  { %v94_v13 = vadd.f32 %v202_v8, %v93_v12  ;;  %v228_v14 = vpop.f32.mrb[3].mxu0  ;;  %v97_v15 = vmax.f32 %v91_v10, 0.0 }
  0xe1   :  { %v98_v16 = vmax.f32 %v94_v13, 0.0 }
  0xe3   :  { %v99_v17 = vpack.c.bf16 %v98_v16, %v97_v15 }
  0xe5   :  { %238 = vmatmul.mubr.msk.bf16.vlgmr.msra.gmra.mrb[0].mxu1 %vm139_vm2, %v99_v17 }
 0x1b8   :  { %v177_v19 = vpop.f32.mrb[0].mxu1 }
 0x1b9   :  { %v178_v20 = vadd.f32 %v207_v18, %v177_v19  ;;  %v239_v21 = vpop.f32.mrb[1].mxu1 }
 0x1ba   :  { %v180_v22 = vpop.f32.mrb[2].mxu1 }
 0x1bb   :  { %184 = vst.msk [vmem:[#allocation2] sm:$0xff] %vm52_vm1, %v178_v20  ;;  %v181_v23 = vadd.f32 %v207_v18, %v180_v22  ;;  %v240_v24 = vpop.f32.mrb[3].mxu1 }
 0x1bd   :  { %185 = vst.msk [vmem:[#allocation2 + $0x8] sm:$0xff] %vm52_vm1, %v181_v23 }
 0x1be   :  { %264 = shalt.err (!%p261_p4)
}
 0x1bf   :  { %s265_s11 = scalar_lea.hbm %s359_s5, 256 }
 0x1c0   :  { %p266_p5 = scmp.ne.s32.totalorder %s359_s5, %s265_s11  ;;  %p269_p6 = scmp.lt.u32.totalorder %s265_s11, %s359_s5 }
 0x1c2   :  { %p271_p7 = pnand %p269_p6, %p266_p5 }
 0x1c4   :  { %274 = shalt.err (!%p271_p7)
}
 0x1c5   :  { %s280_s16 = smov 128   ;;  %s281_s17 = smov 8  }
 0x1c6   :  { %197 = dma.vmem_to_hbm [thread:$0]  %s192_s9, 256, %s359_s5, [#allocation3], %s280_s16, %s280_s16, %s281_s17  }
 0x1c7   :  { %275 = dma.done.wait [#allocation3], 256  }
 0x1c8   :  { %276 = vsyncadd [#allocation3], 4294967040 }
 0x1c9   :  { %201 = vsyncpa [#allocation3], 1 }

</bundles_post_ra>
